<compile_context>
chip_gen: v7x
topology: tpu7x:2x2x1
jax: 0.10.0
libtpu: 0.0.40
codegen_flags: <defaults>
</compile_context>

<pallas_src>
import jax
import jax.numpy as jnp
from jax import lax
from jax.experimental import pallas as pl
from jax.experimental.pallas import tpu as pltpu

# ---------------- config (matches InputProjection.__init__) ----------------
HIDDEN = 32            # hidden_size
NUM_HEADS = 4          # num_attention_heads
NUM_GQA_GROUPS = 2     # num_gqa_groups
HEAD_DIM = HIDDEN // NUM_HEADS                      # 8
KV_DIM = HIDDEN // NUM_HEADS * NUM_GQA_GROUPS       # 16
OUT_DIM = HIDDEN + 2 * KV_DIM                       # 64 (fused q|k|v width)
LN_EPS = 1e-5
TRUNC_STD = 0.02


def _round_up(x, m):
    return (x + m - 1) // m * m


# --------------------------- kernels ---------------------------------------

def _ln_qkv_paired_kernel(x_ref, w_ref, b_ref, o_ref):
    """Two tokens per vreg row (lane-dense stores).
       x_ref: [T2, 2H]  (row r = [token 2r | token 2r+1])
       w_ref: [2H, 2*OUT_DIM] block-diagonal fused weight (LN affine folded)
       b_ref: [1, 2*OUT_DIM]
       o_ref: [T2, 2*OUT_DIM] (row r = [qkv(2r) | qkv(2r+1)])."""
    x = x_ref[...].astype(jnp.float32)
    lane = lax.broadcasted_iota(jnp.int32, x.shape, 1)
    left = lane < HIDDEN

    def seg_mean(v):
        # Per-token (per-32-lane-segment) mean, broadcast back onto the lanes.
        sl = jnp.sum(jnp.where(left, v, 0.0), axis=-1, keepdims=True)
        sr = jnp.sum(jnp.where(left, 0.0, v), axis=-1, keepdims=True)
        return jnp.where(left, sl, sr) * (1.0 / HIDDEN)

    mean = seg_mean(x)
    xc = x - mean
    var = seg_mean(xc * xc)
    xn = (xc * lax.rsqrt(var + LN_EPS)).astype(w_ref.dtype)

    o = jnp.dot(xn, w_ref[...], preferred_element_type=jnp.float32)
    o = o + b_ref[...].astype(jnp.float32)
    o_ref[...] = o.astype(o_ref.dtype)


def _ln_qkv_kernel(x_ref, w_ref, b_ref, o_ref):
    """Fallback (odd token counts): one token per row, 64-wide output."""
    x = x_ref[...].astype(jnp.float32)
    mean = jnp.mean(x, axis=-1, keepdims=True)
    xc = x - mean
    var = jnp.mean(xc * xc, axis=-1, keepdims=True)
    xn = (xc * lax.rsqrt(var + LN_EPS)).astype(w_ref.dtype)
    o = jnp.dot(xn, w_ref[...], preferred_element_type=jnp.float32)
    o_ref[...] = (o + b_ref[...].astype(jnp.float32)).astype(o_ref.dtype)


# --------------------------- parameter prep --------------------------------

def prepare_params(params, compute_dtype=jnp.float32):
    """One-time prep: transpose, concat q|k|v, fold LN affine, build the
       block-diagonal token-pair weight.  Call once, reuse across calls."""
    ln_w = params["layer_norm_weight"].astype(jnp.float32)
    ln_b = params["layer_norm_bias"].astype(jnp.float32)
    # F.linear(x, W) = x @ W.T  -> stack transposed weights side by side.
    w_cat = jnp.concatenate(
        [params["query_weight"].T,
         params["key_weight"].T,
         params["value_weight"].T], axis=1).astype(jnp.float32)      # [H, 64]
    b_cat = jnp.concatenate(
        [params["query_bias"],
         params["key_bias"],
         params["value_bias"]], axis=0).astype(jnp.float32)          # [64]
    # Fold LN affine: ((xn*lnw + lnb) @ W + b) == xn @ (diag(lnw) W) + (lnb@W + b)
    w_fused = (ln_w[:, None] * w_cat).astype(compute_dtype)          # [H, 64]
    b_fused = (ln_b @ w_cat + b_cat).reshape(1, OUT_DIM)             # [1, 64] f32

    zeros = jnp.zeros_like(w_fused)
    w_pair = jnp.concatenate(
        [jnp.concatenate([w_fused, zeros], axis=1),
         jnp.concatenate([zeros, w_fused], axis=1)], axis=0)         # [2H, 128]
    b_pair = jnp.concatenate([b_fused, b_fused], axis=1)             # [1, 128]
    return {"w": w_fused, "b": b_fused, "w_pair": w_pair, "b_pair": b_pair}


# --------------------------- tile selection ---------------------------------

def _select_tile_n(N, itemsize, tile_n=None):
    """Token-tile size (in tokens).  Generation-aware via VMEM capacity."""
    if tile_n is None:
        try:
            vmem_bytes = int(pltpu.get_tpu_info().vmem_capacity_bytes)
        except Exception:
            vmem_bytes = 64 << 20          # conservative: v7x per-TC VMEM
        # Budget ~40% of physical VMEM for double-buffered x + out tiles.
        per_token = 2 * (HIDDEN + OUT_DIM) * itemsize
        tile_cap = int(vmem_bytes * 0.4) // per_token
        tile_cap = max(8192, min(65536, tile_cap)) // 512 * 512
    else:
        tile_cap = max(16, (tile_n // 16) * 16)

    if N <= tile_cap:
        if N > 8192 and N % 2 == 0:
            # Keep >= 2 grid steps so both v7x TensorCores get work.
            return _round_up((N + 1) // 2, 16)
        return N
    return tile_cap


# --------------------------- forward wrapper --------------------------------

def input_projection_pallas(x, fused_params, *, tile_n=None):
    """x: [B, S, H] ('bshd').  Returns (q, k, v) with q: [B, h, S, d],
       k/v: [B, h_kv, g*S, d] — same as the torch module."""
    B, S, H = x.shape
    assert H == HIDDEN
    N = B * S
    itemsize = jnp.dtype(x.dtype).itemsize
    tile = _select_tile_n(N, itemsize, tile_n)
    grid = (pl.cdiv(N, tile),)
    paired = (N % 2 == 0) and (tile % 2 == 0)

    vmem_limit = int(max(32 << 20,
                         2 * tile * (HIDDEN + OUT_DIM) * itemsize + (16 << 20)))
    cost = pl.CostEstimate(
        flops=2 * N * HIDDEN * OUT_DIM,
        transcendentals=N,                                    # one rsqrt / token
        bytes_accessed=N * (HIDDEN + OUT_DIM) * itemsize
        + 4 * (2 * HIDDEN) * (2 * OUT_DIM))
    cparams = pltpu.CompilerParams(
        dimension_semantics=("parallel",),                    # megacore on v7x
        vmem_limit_bytes=vmem_limit)

    if paired:
        # Free row-major reinterpretation: row r = [token 2r | token 2r+1].
        x_in = x.reshape(N // 2, 2 * HIDDEN)
        out2d = pl.pallas_call(
            _ln_qkv_paired_kernel,
            out_shape=jax.ShapeDtypeStruct((N // 2, 2 * OUT_DIM), x.dtype),
            grid_spec=pl.GridSpec(
                grid=grid,
                in_specs=[
                    pl.BlockSpec((tile // 2, 2 * HIDDEN), lambda i: (i, 0)),
                    pl.BlockSpec((2 * HIDDEN, 2 * OUT_DIM), lambda i: (0, 0)),
                    pl.BlockSpec((1, 2 * OUT_DIM), lambda i: (0, 0)),
                ],
                out_specs=pl.BlockSpec((tile // 2, 2 * OUT_DIM),
                                       lambda i: (i, 0)),
            ),
            compiler_params=cparams,
            cost_estimate=cost,
        )(x_in, fused_params["w_pair"], fused_params["b_pair"])
        out2d = out2d.reshape(N, OUT_DIM)      # free row-major reinterpretation
    else:
        # Rare odd-N fallback: one token per row, 64-wide (masked) stores.
        x_in = x.reshape(N, HIDDEN)
        out2d = pl.pallas_call(
            _ln_qkv_kernel,
            out_shape=jax.ShapeDtypeStruct((N, OUT_DIM), x.dtype),
            grid_spec=pl.GridSpec(
                grid=grid,
                in_specs=[
                    pl.BlockSpec((tile, HIDDEN), lambda i: (i, 0)),
                    pl.BlockSpec((HIDDEN, OUT_DIM), lambda i: (0, 0)),
                    pl.BlockSpec((1, OUT_DIM), lambda i: (0, 0)),
                ],
                out_specs=pl.BlockSpec((tile, OUT_DIM), lambda i: (i, 0)),
            ),
            compiler_params=cparams,
            cost_estimate=cost,
        )(x_in, fused_params["w"], fused_params["b"])

    q2d = out2d[:, :HIDDEN]
    k2d = out2d[:, HIDDEN:HIDDEN + KV_DIM]
    v2d = out2d[:, HIDDEN + KV_DIM:]

    # ----- rearranges ('bshd' branch): pure layout, plain JAX -----
    # TODO(synk): a downstream attention kernel could consume the fused [N, 64]
    # slab directly via its own BlockSpec column slices, avoiding this extra
    # HBM read+write of q/k/v.
    d, g, h = HEAD_DIM, NUM_GQA_GROUPS, NUM_HEADS
    h_kv = KV_DIM // (g * d)

    q = q2d.reshape(B, S, h, d).transpose(0, 2, 1, 3)
    k = (k2d.reshape(B, S, g, h_kv, d)
             .transpose(0, 3, 2, 1, 4)
             .reshape(B, h_kv, g * S, d))
    v = (v2d.reshape(B, S, g, h_kv, d)
             .transpose(0, 3, 2, 1, 4)
             .reshape(B, h_kv, g * S, d))
    return q, k, v


# --------------------------- reference & init -------------------------------

def _reference(x, params):
    """Pure-JAX reference mirroring forward_input_projection (self-attn path)."""
    xf = x.astype(jnp.float32)
    mean = jnp.mean(xf, axis=-1, keepdims=True)
    var = jnp.mean((xf - mean) ** 2, axis=-1, keepdims=True)
    xn = (xf - mean) * lax.rsqrt(var + LN_EPS)
    xn = xn * params["layer_norm_weight"] + params["layer_norm_bias"]
    q = xn @ params["query_weight"].T + params["query_bias"]
    k = xn @ params["key_weight"].T + params["key_bias"]
    v = xn @ params["value_weight"].T + params["value_bias"]
    B, S, _ = x.shape
    d, g, h = HEAD_DIM, NUM_GQA_GROUPS, NUM_HEADS
    h_kv = KV_DIM // (g * d)
    q = q.reshape(B, S, h, d).transpose(0, 2, 1, 3)
    k = k.reshape(B, S, g, h_kv, d).transpose(0, 3, 2, 1, 4).reshape(B, h_kv, g * S, d)
    v = v.reshape(B, S, g, h_kv, d).transpose(0, 3, 2, 1, 4).reshape(B, h_kv, g * S, d)
    return q, k, v


def init_params(key):
    kq, kk, kv = jax.random.split(key, 3)

    def trunc(k, shape):
        return TRUNC_STD * jax.random.truncated_normal(k, -2.0, 2.0, shape, jnp.float32)

    return {
        "layer_norm_weight": jnp.ones((HIDDEN,), jnp.float32),
        "layer_norm_bias": jnp.zeros((HIDDEN,), jnp.float32),
        "query_weight": trunc(kq, (HIDDEN, HIDDEN)),
        "key_weight": trunc(kk, (KV_DIM, HIDDEN)),
        "value_weight": trunc(kv, (KV_DIM, HIDDEN)),
        "query_bias": jnp.zeros((HIDDEN,), jnp.float32),
        "key_bias": jnp.zeros((KV_DIM,), jnp.float32),
        "value_bias": jnp.zeros((KV_DIM,), jnp.float32),
    }


if __name__ == "__main__":
    key = jax.random.PRNGKey(0)
    kx, kp, kx2, kx3 = jax.random.split(key, 4)
    B, S = 2, 8
    x = jax.random.normal(kx, (B, S, HIDDEN), jnp.float32)   # bshd layout
    params = init_params(kp)

    fused = prepare_params(params, compute_dtype=x.dtype)

    # Primary run (small shapes, single block).
    q, k, v = input_projection_pallas(x, fused)
    jax.block_until_ready((q, k, v))

    q_ref, k_ref, v_ref = _reference(x, params)
    assert q.shape == (B, NUM_HEADS, S, HEAD_DIM)
    assert k.shape == (B, KV_DIM // (NUM_GQA_GROUPS * HEAD_DIM),
                       NUM_GQA_GROUPS * S, HEAD_DIM)
    assert v.shape == k.shape
    for got, ref in ((q, q_ref), (k, k_ref), (v, v_ref)):
        assert jnp.max(jnp.abs(got - ref)) < 1e-4, "mismatch vs reference"

    # Exercise the multi-step grid + ragged last block (forced tiny tile).
    x2 = jax.random.normal(kx2, (2, 52, HIDDEN), jnp.float32)   # N=104, !% 16
    q2, k2, v2 = input_projection_pallas(x2, fused, tile_n=16)
    q2r, k2r, v2r = _reference(x2, params)
    for got, ref in ((q2, q2r), (k2, k2r), (v2, v2r)):
        assert jnp.max(jnp.abs(got - ref)) < 1e-4, "ragged-grid mismatch"

    # Exercise the odd-token-count fallback path.
    x3 = jax.random.normal(kx3, (1, 9, HIDDEN), jnp.float32)    # N=9 (odd)
    q3, k3, v3 = input_projection_pallas(x3, fused)
    q3r, k3r, v3r = _reference(x3, params)
    for got, ref in ((q3, q3r), (k3, k3r), (v3, v3r)):
        assert jnp.max(jnp.abs(got - ref)) < 1e-4, "odd-N fallback mismatch"

    print("KERNEL_OK")
</pallas_src>

<mosaic_0001>
module attributes {stable_mosaic.version = 11 : i64} {
  func.func @_ln_qkv_paired_kernel(%arg0: i32, %arg1: memref<8x64xf32, #tpu.memory_space<vmem>>, %arg2: memref<64x128xf32, #tpu.memory_space<vmem>>, %arg3: memref<1x128xf32, #tpu.memory_space<vmem>>, %arg4: memref<8x128xf32, #tpu.memory_space<vmem>>) attributes {dimension_semantics = [#tpu.dimension_semantics<parallel>], iteration_bounds = array<i64: 1>, scalar_prefetch = 0 : i64, scratch_operands = 0 : i64, tpu.core_type = #tpu.core_type<tc>, window_params = [{transform_indices = @transform_0, window_bounds = array<i64: 8, 64>}, {pipeline_mode = #tpu.pipeline_mode<synchronous>, transform_indices = @transform_1, window_bounds = array<i64: 64, 128>}, {pipeline_mode = #tpu.pipeline_mode<synchronous>, transform_indices = @transform_2, window_bounds = array<i64: 1, 128>}, {transform_indices = @transform_3, window_bounds = array<i64: 8, 128>}]} {
    %c0 = arith.constant 0 : index
    %c0_0 = arith.constant 0 : index
    %0 = vector.load %arg1[%c0, %c0_0] : memref<8x64xf32, #tpu.memory_space<vmem>>, vector<8x64xf32>
    %1 = tpu.iota {dimensions = array<i32: 1>} : vector<8x64xi32>
    %c32_i32 = arith.constant 32 : i32
    %2 = vector.broadcast %c32_i32 : i32 to vector<8x64xi32>
    %3 = arith.cmpi slt, %1, %2 : vector<8x64xi32>
    %cst = arith.constant 0.000000e+00 : f32
    %4 = vector.broadcast %cst : f32 to vector<8x64xf32>
    %5 = arith.select %3, %0, %4 : vector<8x64xi1>, vector<8x64xf32>
    %cst_1 = arith.constant dense<0.000000e+00> : vector<8xf32>
    %6 = vector.multi_reduction <add>, %5, %cst_1 [1] : vector<8x64xf32> to vector<8xf32>
    %7 = vector.shape_cast %6 : vector<8xf32> to vector<8x1xf32>
    %cst_2 = arith.constant 0.000000e+00 : f32
    %8 = vector.broadcast %cst_2 : f32 to vector<8x64xf32>
    %9 = arith.select %3, %8, %0 : vector<8x64xi1>, vector<8x64xf32>
    %cst_3 = arith.constant dense<0.000000e+00> : vector<8xf32>
    %10 = vector.multi_reduction <add>, %9, %cst_3 [1] : vector<8x64xf32> to vector<8xf32>
    %11 = vector.shape_cast %10 : vector<8xf32> to vector<8x1xf32>
    %12 = vector.shape_cast %7 : vector<8x1xf32> to vector<8x1xf32>
    %13 = vector.broadcast %12 : vector<8x1xf32> to vector<8x64xf32>
    %14 = vector.shape_cast %11 : vector<8x1xf32> to vector<8x1xf32>
    %15 = vector.broadcast %14 : vector<8x1xf32> to vector<8x64xf32>
    %16 = arith.select %3, %13, %15 : vector<8x64xi1>, vector<8x64xf32>
    %cst_4 = arith.constant 3.125000e-02 : f32
    %17 = vector.broadcast %cst_4 : f32 to vector<8x64xf32>
    %18 = arith.mulf %16, %17 : vector<8x64xf32>
    %19 = arith.subf %0, %18 : vector<8x64xf32>
    %20 = arith.mulf %19, %19 : vector<8x64xf32>
    %cst_5 = arith.constant 0.000000e+00 : f32
    %21 = vector.broadcast %cst_5 : f32 to vector<8x64xf32>
    %22 = arith.select %3, %20, %21 : vector<8x64xi1>, vector<8x64xf32>
    %cst_6 = arith.constant dense<0.000000e+00> : vector<8xf32>
    %23 = vector.multi_reduction <add>, %22, %cst_6 [1] : vector<8x64xf32> to vector<8xf32>
    %24 = vector.shape_cast %23 : vector<8xf32> to vector<8x1xf32>
    %cst_7 = arith.constant 0.000000e+00 : f32
    %25 = vector.broadcast %cst_7 : f32 to vector<8x64xf32>
    %26 = arith.select %3, %25, %20 : vector<8x64xi1>, vector<8x64xf32>
    %cst_8 = arith.constant dense<0.000000e+00> : vector<8xf32>
    %27 = vector.multi_reduction <add>, %26, %cst_8 [1] : vector<8x64xf32> to vector<8xf32>
    %28 = vector.shape_cast %27 : vector<8xf32> to vector<8x1xf32>
    %29 = vector.shape_cast %24 : vector<8x1xf32> to vector<8x1xf32>
    %30 = vector.broadcast %29 : vector<8x1xf32> to vector<8x64xf32>
    %31 = vector.shape_cast %28 : vector<8x1xf32> to vector<8x1xf32>
    %32 = vector.broadcast %31 : vector<8x1xf32> to vector<8x64xf32>
    %33 = arith.select %3, %30, %32 : vector<8x64xi1>, vector<8x64xf32>
    %cst_9 = arith.constant 3.125000e-02 : f32
    %34 = vector.broadcast %cst_9 : f32 to vector<8x64xf32>
    %35 = arith.mulf %33, %34 : vector<8x64xf32>
    %cst_10 = arith.constant 9.99999974E-6 : f32
    %36 = vector.broadcast %cst_10 : f32 to vector<8x64xf32>
    %37 = arith.addf %35, %36 : vector<8x64xf32>
    %38 = math.rsqrt %37 : vector<8x64xf32>
    %39 = arith.mulf %19, %38 : vector<8x64xf32>
    %c0_11 = arith.constant 0 : index
    %c0_12 = arith.constant 0 : index
    %40 = vector.load %arg2[%c0_11, %c0_12] : memref<64x128xf32, #tpu.memory_space<vmem>>, vector<64x128xf32>
    %cst_13 = arith.constant dense<0.000000e+00> : vector<8x128xf32>
    %41 = tpu.matmul %39, %40, %cst_13 {dimension_numbers = #tpu.dot_dimension_numbers<[1], [0], [0], [1], [0, 0, 1, 1], [], []>} : vector<8x64xf32>, vector<64x128xf32>, vector<8x128xf32> -> vector<8x128xf32>
    %c0_14 = arith.constant 0 : index
    %c0_15 = arith.constant 0 : index
    %42 = vector.load %arg3[%c0_14, %c0_15] : memref<1x128xf32, #tpu.memory_space<vmem>>, vector<1x128xf32>
    %43 = vector.broadcast %42 : vector<1x128xf32> to vector<8x128xf32>
    %44 = arith.addf %41, %43 : vector<8x128xf32>
    %c0_16 = arith.constant 0 : index
    %c0_17 = arith.constant 0 : index
    %45 = vector.load %arg4[%c0_16, %c0_17] : memref<8x128xf32, #tpu.memory_space<vmem>>, vector<8x128xf32>
    tpu.vector_store %arg4[%c0_16, %c0_17], %44 {strides = array<i32>} : memref<8x128xf32, #tpu.memory_space<vmem>>, vector<8x128xf32>,
    return
  }
  func.func @transform_0(%arg0: i32) -> (i32, i32) {
    %c0_i32 = arith.constant 0 : i32
    %c0_i32_0 = arith.constant 0 : i32
    return %arg0, %c0_i32 : i32, i32
  }
  func.func @transform_1(%arg0: i32) -> (i32, i32) {
    %c0_i32 = arith.constant 0 : i32
    %c0_i32_0 = arith.constant 0 : i32
    %c0_i32_1 = arith.constant 0 : i32
    return %c0_i32, %c0_i32_0 : i32, i32
  }
  func.func @transform_2(%arg0: i32) -> (i32, i32) {
    %c0_i32 = arith.constant 0 : i32
    %c0_i32_0 = arith.constant 0 : i32
    %c0_i32_1 = arith.constant 0 : i32
    return %c0_i32, %c0_i32_0 : i32, i32
  }
  func.func @transform_3(%arg0: i32) -> (i32, i32) {
    %c0_i32 = arith.constant 0 : i32
    %c0_i32_0 = arith.constant 0 : i32
    return %arg0, %c0_i32 : i32, i32
  }
}

</mosaic_0001>

<bundles_post_ra>
// kernel: tpu_custom_call.1
= control target key start
LH: loop header
LB: loop body
LE: loop exit
PB: predicated region body
PF: predicated region fallthrough
CT: control target
= control target key end

     0   :  { %8 = vsyncpa [#allocation3], 0  ;;  %s385_s0 = inlined_call_operand.hbm [shape: f32[8,64], index: 0, kind: input, shape index: {}]   ;;  %s386_s1 = inlined_call_operand.hbm [shape: f32[64,128], index: 1, kind: input, shape index: {}]   ;;  %s387_s2 = inlined_call_operand.vmem [shape: f32[1,128], index: 2, kind: input, shape index: {}]   ;;  %s388_s3 = inlined_call_operand.hbm [shape: f32[8,128], index: 3, kind: output, shape index: {}]  }
   0x1   :  { %9 = vsyncpa [#allocation6], 0 }
   0x2   :  { %10 = vsyncpa [#allocation4], 0  ;;  %s300_s12 = smov [#allocation2]   ;;  %s301_s14 = smov [#allocation5]  }
   0x3   :  { %s17_s13 = sshll.u32 %s300_s12, 4  ;;  %s26_s15 = sshll.u32 %s301_s14, 4  ;;  %s18_s13 = int_to_ptr.vmem [resolvable:$true] %s17_s13  ;;  %s328_s15 = int_to_ptr.vmem [resolvable:$true] %s26_s15 }
   0x4   :  { %s228_s18 = scalar_lea.hbm %s385_s0, 128 }
   0x5   :  { %p229_p0 = scmp.ne.s32.totalorder %s385_s0, %s228_s18  ;;  %p232_p1 = scmp.lt.u32.totalorder %s228_s18, %s385_s0 }
   0x7   :  { %p234_p2 = pnand %p232_p1, %p229_p0 }
   0x9   :  { %237 = shalt.err (!%p234_p2)
}
   0xa   :  { %s238_s23 = scalar_lea.vmem %s18_s13, 128  ;;  %p243_p4 = scmp.lt.s32.totalorder %s18_s13, %s18_s13 }
   0xb   :  { %p239_p3 = scmp.ne.s32.totalorder %s18_s13, %s238_s23  ;;  %p244_p5 = scmp.lt.s32.totalorder %s238_s23, %s238_s23 }
   0xd   :  { %p245_p6 = por %p244_p5, %p243_p4 }
   0xf   :  { %p246_p7 = pnand %p245_p6, %p239_p3 }
  0x11   :  { %249 = shalt.err (!%p246_p7)
}
  0x12   :  { %20 = dma.hbm_to_vmem [thread:$0]  %s385_s0, 128, %s18_s13, [#allocation3]  }
  0x13   :  { %s250_s28 = scalar_lea.hbm %s386_s1, 1024 }
  0x14   :  { %p251_p8 = scmp.ne.s32.totalorder %s386_s1, %s250_s28  ;;  %p254_p9 = scmp.lt.u32.totalorder %s250_s28, %s386_s1 }
  0x16   :  { %p256_p10 = pnand %p254_p9, %p251_p8 }
  0x18   :  { %259 = shalt.err (!%p256_p10)
}
  0x19   :  { %s260_s6 = scalar_lea.vmem %s328_s15, 1024  ;;  %p265_p12 = scmp.lt.s32.totalorder %s328_s15, %s328_s15 }
  0x1a   :  { %p261_p11 = scmp.ne.s32.totalorder %s328_s15, %s260_s6  ;;  %p266_p13 = scmp.lt.s32.totalorder %s260_s6, %s260_s6 }
  0x1c   :  { %p267_p0 = por %p266_p13, %p265_p12 }
  0x1e   :  { %p268_p1 = pnand %p267_p0, %p261_p11 }
  0x20   :  { %271 = shalt.err (!%p268_p1)
}
  0x21   :  { %s302_s0 = smov 128   ;;  %s303_s7 = smov 8  }
  0x22   :  { %32 = dma.hbm_to_vmem [thread:$0]  %s386_s1, 1024, %s328_s15, [#allocation6], %s302_s0, %s302_s0, %s303_s7  }
  0x23   :  { %294 = dma.done.wait [#allocation3], 128  }
  0x24   :  { %295 = vsyncadd [#allocation3], 4294967168 }
  0x25   :  { %296 = dma.done.wait [#allocation6], 1024  }
  0x26   :  { %297 = vsyncadd [#allocation6], 4294966272  ;;  %v42_v0 = vlaneseq  ;;  %vm46_vm1 = vcmask 523264   ;;  %v41_v2 = vld [vmem:[#allocation2] sm:$0xff]  ;;  %v71_v17 = vld [vmem:[#allocation5] sm:$0xff]  ;;  %v304_v20 = vmov 0.0|0.0  }
  0x27   :  { %v72_v18 = vld [vmem:[#allocation5 + $0x8] sm:$0xff]  ;;  %206 = vmatprep.subr.bf16.mxu0 %v304_v20  ;;  %v73_v21 = vld [vmem:[#allocation5 + $0x10] sm:$0xff]  ;;  %v74_v22 = vld [vmem:[#allocation5 + $0x18] sm:$0xff]  ;;  %vm305_vm2 = vmmov 0   ;;  %v306_v26 = vmov 0.0   ;;  %s307_s11 = smov [#allocation7]  }
  0x28   :  { %v43_v1 = vand.u32 127, %v42_v0  ;;  %v207_v19 = vpack.c.bf16 %v72_v18, %v71_v17  ;;  %v210_v23 = vpack.c.bf16 %v74_v22, %v73_v21  ;;  %v75_v24 = vld [vmem:[#allocation5 + $0x20] sm:$0xff]  ;;  %v76_v25 = vld [vmem:[#allocation5 + $0x28] sm:$0xff]  ;;  %203 = vmatprep.mubr.msk.f32.mxu0 %vm305_vm2, %v306_v26  ;;  %v77_v28 = vld [vmem:[#allocation5 + $0x30] sm:$0xff]  ;;  %s166_s12 = sshll.u32 %s307_s11, 4  ;;  %s167_s12 = int_to_ptr.vmem [resolvable:$true] %s166_s12 }
  0x29   :  { %v213_v27 = vpack.c.bf16 %v76_v25, %v75_v24  ;;  %v78_v29 = vld [vmem:[#allocation5 + $0x38] sm:$0xff]  ;;  %s272_s13 = scalar_lea.vmem %s167_s12, 128  ;;  %p277_p3 = scmp.lt.s32.totalorder %s167_s12, %s167_s12 }
  0x2a   :  { %vm44_vm0 = vcmp.lt.s32.totalorder %v43_v1, 32  ;;  %208 = vmatpush3.bf16.msra.mxu0 %v207_v19  ;;  %v216_v30 = vpack.c.bf16 %v78_v29, %v77_v28  ;;  %v176_v38 = vld [vmem:[%s387_s2] ss:$0 sm:$0xff]  ;;  %p273_p2 = scmp.ne.s32.totalorder %s167_s12, %s272_s13  ;;  %p278_p4 = scmp.lt.s32.totalorder %s272_s13, %s272_s13 }
  0x2b   :  { %v45_v3 = vsel %vm44_vm0, %v41_v2, 0.0  ;;  %v50_v4 = vsel %vm44_vm0, 0.0, %v41_v2  ;;  %209 = vmatprep.subr.bf16.mxu0 %v304_v20 }
  0x2c   :  { %v47_v5 = vsel %vm46_vm1, %v45_v3, 0.0  ;;  %v51_v6 = vsel %vm46_vm1, %v50_v4, 0.0  ;;  %p279_p5 = por %p278_p4, %p277_p3 }
  0x2d   :  { %48 = vadd.xlane.f32.xlu0 %v47_v5 }
  0x2e   :  { %211 = vmatpush3.bf16.msra.mxu0 %v210_v23  ;;  %p280_p6 = pnand %p279_p5, %p273_p2 }
  0x2f   :  { %212 = vmatprep.subr.bf16.mxu0 %v304_v20 }
  0x31   :  { %52 = vadd.xlane.f32.xlu0 %v51_v6 }
  0x32   :  { %214 = vmatpush3.bf16.msra.mxu0 %v213_v27 }
  0x33   :  { %215 = vmatprep.subr.bf16.mxu0 %v304_v20 }
  0x36   :  { %217 = vmatpush3.bf16.msra.mxu0 %v216_v30 }
  0xba   :  { %v49_v7 = vpop.xlane.xlu0 %48 }
  0xbe   :  { %v53_v8 = vpop.xlane.xlu0 %52 }
  0xbf   :  { %v54_v9 = vsel %vm44_vm0, %v49_v7, %v53_v8 }
  0xc0   :  { %v55_v10 = vmul.f32 0.03125, %v54_v9 }
  0xc2   :  { %v56_v11 = vsub.f32 %v41_v2, %v55_v10 }
  0xc4   :  { %v57_v12 = vmul.f32 %v56_v11, %v56_v11 }
  0xc6   :  { %v58_v13 = vsel %vm44_vm0, %v57_v12, 0.0  ;;  %v62_v15 = vsel %vm44_vm0, 0.0, %v57_v12 }
  0xc7   :  { %v59_v14 = vsel %vm46_vm1, %v58_v13, 0.0  ;;  %v63_v16 = vsel %vm46_vm1, %v62_v15, 0.0 }
  0xc8   :  { %60 = vadd.xlane.f32.xlu1 %v59_v14 }
  0xcc   :  { %64 = vadd.xlane.f32.xlu1 %v63_v16 }
 0x155   :  { %v61_v31 = vpop.xlane.xlu1 %60 }
 0x159   :  { %v65_v32 = vpop.xlane.xlu1 %64 }
 0x15a   :  { %v66_v33 = vsel %vm44_vm0, %v61_v31, %v65_v32 }
 0x15b   :  { %v67_v34 = vmul.f32 0.03125, %v66_v33 }
 0x15d   :  { %v68_v35 = vadd.f32 1e-05, %v67_v34 }
 0x15f   :  { %226 = vrsqrt.f32 %v68_v35 }
 0x169   :  { %v227_v36 = vpop.eup %226 }
 0x16a   :  { %v70_v37 = vmul.f32 %v227_v36, %v56_v11 }
 0x16c   :  { %204 = vmatmul.mubr.msk.f32.vlgmr.msra.gmra.mrb[0].mxu0 %vm46_vm1, %v70_v37 }
 0x23f   :  { %v155_v39 = vpop.f32.mrb[0].mxu0 }
 0x240   :  { %v156_v40 = vadd.f32 %v176_v38, %v155_v39  ;;  %v205_v41 = vpop.f32.mrb[1].mxu0 }
 0x242   :  { %159 = vst [vmem:[#allocation7] sm:$0xff] %v156_v40 }
 0x243   :  { %283 = shalt.err (!%p280_p6)
}
 0x244   :  { %s284_s16 = scalar_lea.hbm %s388_s3, 128 }
 0x245   :  { %p285_p7 = scmp.ne.s32.totalorder %s388_s3, %s284_s16  ;;  %p288_p8 = scmp.lt.u32.totalorder %s284_s16, %s388_s3 }
 0x247   :  { %p290_p9 = pnand %p288_p8, %p285_p7 }
 0x249   :  { %293 = shalt.err (!%p290_p9)
}
 0x24a   :  { %169 = dma.vmem_to_hbm [thread:$0]  %s167_s12, 128, %s388_s3, [#allocation4]  }
 0x24b   :  { %298 = dma.done.wait [#allocation4], 128  }
 0x24c   :  { %299 = vsyncadd [#allocation4], 4294967168 }
 0x24d   :  { %173 = vsyncpa [#allocation3], 1 }
 0x24e   :  { %174 = vsyncpa [#allocation6], 1 }
 0x24f   :  { %175 = vsyncpa [#allocation4], 1 }

</bundles_post_ra>
